<compile_context>
chip_gen: v6e
topology: v6e:2x2x1
jax: 0.10.0
libtpu: 0.0.40
codegen_flags: <defaults>
</compile_context>

<pallas_src>
import jax
import jax.numpy as jnp
from jax import lax
from jax.experimental import pallas as pl
from jax.experimental.pallas import tpu as pltpu

EPS = 1e-5  # nn.LayerNorm default eps


def _round_up(x, m):
    return ((x + m - 1) // m) * m


def _layernorm(x, gamma, beta):
    # two-pass (centered) variance: numerically robust, same op count
    mean = jnp.mean(x, axis=-1, keepdims=True)
    c = x - mean
    var = jnp.mean(c * c, axis=-1, keepdims=True)
    return c * lax.rsqrt(var + EPS) * gamma + beta


def _kernel(emb_ref,                                     # (tn, D) gathered item rows
            w_vfI_ref, b_vf_ref, n1_g_ref, n1_b_ref,     # attn+residual fold, LN1
            ff1_w_ref, ff1_b_ref, ff2_w_ref, ff2_b_ref,  # feed-forward
            w_ti_ref, s_user_ref,                        # folded tail (item half), user scalar
            out_ref):                                    # (1, tn) lane-dense logits
    item_emb = emb_ref[...]                                             # (tn, D)

    # ---- TransformerBlockKan (eval, seq-len 1): attn(x)+x == x @ (wv@fc + I) + b ----
    x_pre = jnp.dot(item_emb, w_vfI_ref[...],
                    preferred_element_type=jnp.float32) + b_vf_ref[...]
    x = _layernorm(x_pre, n1_g_ref[...], n1_b_ref[...])                 # (tn, D)
    h = jnp.maximum(
        jnp.dot(x, ff1_w_ref[...],
                preferred_element_type=jnp.float32) + ff1_b_ref[...], 0.0)
    ffwd = jnp.dot(h, ff2_w_ref[...],
                   preferred_element_type=jnp.float32) + ff2_b_ref[...]
    y = ffwd + x

    # ---- LayerNorm-2: normalization only (its affine is folded into w_ti / s_user) ----
    mean = jnp.mean(y, axis=-1, keepdims=True)
    c = y - mean
    var = jnp.mean(c * c, axis=-1, keepdims=True)
    y_hat = c * lax.rsqrt(var + EPS)                                    # (tn, D)

    # ---- fused fc0/fc1/affine tail: M = tn matmul against a (D, 1) column ----
    logits = jnp.dot(y_hat, w_ti_ref[...],
                     preferred_element_type=jnp.float32) + s_user_ref[...]   # (tn, 1)
    out_ref[...] = jnp.transpose(jax.nn.sigmoid(logits))                # (1, tn)


def ufgraphfr_forward(x, uef, p):
    """x: int32 [1, N] (items = x[0]); uef: float32 [1, embed_dim]."""
    items = x[0].astype(jnp.int32)
    n = items.shape[0]
    d = p["emb_item"].shape[1]
    f32 = jnp.float32

    # ---------- host-side weight folding (static, exact linear algebra) ----------
    w_vfI = p["wv_w"] @ p["attn_fc_w"] + jnp.eye(d, dtype=f32)           # attn + residual
    b_vf = p["wv_b"] @ p["attn_fc_w"] + p["attn_fc_b"]
    w_tail = p["fc0_w"] @ p["fc1_w"] @ p["aff_w"]                        # (2D, 1)
    b_tail = (p["fc0_b"] @ p["fc1_w"] + p["fc1_b"]) @ p["aff_w"] + p["aff_b"]  # (1, 1)
    w_tu = w_tail[:d, :]                                                 # (D, 1) user half
    w_ti_raw = w_tail[d:, :]                                             # (D, 1) item half
    w_ti = w_ti_raw * jnp.reshape(p["n2_g"], (d, 1))                     # LN2 gamma folded
    b_ln2 = p["n2_b"] @ w_ti_raw                                         # LN2 beta folded (1,1)

    # ---------- user branch hoisted out of the kernel (block-invariant) ----------
    ue = uef.astype(f32) @ p["eu_w"] + p["eu_b"]                         # (1, D)
    uo = jax.nn.sigmoid((ue @ p["um1_w"] + p["um1_b"]) @ p["um2_w"] + p["um2_b"])
    s_user = uo @ w_tu + b_tail + b_ln2                                  # (1, 1)

    # ---------- block the item axis ----------
    # single block for small N (block == full dims); otherwise >=2 blocks whose
    # width is a multiple of 128 lanes so the (1, tn) output store is unmasked
    # and the "parallel" grid axis can split across v7x's two TensorCores.
    n8 = _round_up(n, 8)
    if n8 <= 256:
        tn = n8
    else:
        tn = min(512, _round_up((n8 + 1) // 2, 128))
    n_pad = _round_up(n, tn)
    num_blocks = n_pad // tn

    items_pad = jnp.zeros((n_pad,), jnp.int32).at[:n].set(items)
    gathered = p["emb_item"].astype(f32)[items_pad]                      # (n_pad, D)

    tensor_args = [
        gathered,
        w_vfI, b_vf, p["n1_g"], p["n1_b"],
        p["ff1_w"], p["ff1_b"], p["ff2_w"], p["ff2_b"],
        w_ti, s_user,
    ]

    def _resident(shape):
        nd = len(shape)
        return pl.BlockSpec(shape, lambda g, nd=nd: (0,) * nd)

    in_specs = [pl.BlockSpec((tn, d), lambda g: (g, 0))] + \
               [_resident(a.shape) for a in tensor_args[1:]]

    out = pl.pallas_call(
        _kernel,
        grid_spec=pltpu.PrefetchScalarGridSpec(
            num_scalar_prefetch=0,
            grid=(num_blocks,),
            in_specs=in_specs,
            out_specs=pl.BlockSpec((1, tn), lambda g: (0, g)),
        ),
        out_shape=jax.ShapeDtypeStruct((1, n_pad), f32),
        compiler_params=pltpu.CompilerParams(
            dimension_semantics=("parallel",)),
    )(*tensor_args)

    return out[0, :n].reshape(n, 1)


# ------------------------- pure-JAX reference (unfused) -------------------------
def _layernorm_ref(x, gamma, beta):
    mean = jnp.mean(x, axis=-1, keepdims=True)
    var = jnp.mean((x - mean) ** 2, axis=-1, keepdims=True)
    return (x - mean) * lax.rsqrt(var + EPS) * gamma + beta


def reference_forward(x, uef, p, n_heads=8):
    items = x[0]
    n = items.shape[0]
    ue = uef @ p["eu_w"] + p["eu_b"]
    user_emb = jnp.broadcast_to(ue, (n, ue.shape[-1]))
    item_emb = p["emb_item"][items]
    d = item_emb.shape[-1]
    dh = d // n_heads
    # full multi-head attention exactly as written in the PyTorch module
    q = item_emb @ p["wq_w"] + p["wq_b"]
    k = item_emb @ p["wk_w"] + p["wk_b"]
    v = item_emb @ p["wv_w"] + p["wv_b"]
    Q = q.reshape(n, 1, n_heads, dh).transpose(0, 2, 1, 3)
    K = k.reshape(n, 1, n_heads, dh).transpose(0, 2, 1, 3)
    V = v.reshape(n, 1, n_heads, dh).transpose(0, 2, 1, 3)
    att = jnp.einsum("bhqd,bhkd->bhqk", Q, K) / jnp.sqrt(jnp.float32(dh))
    att = jax.nn.softmax(att, axis=-1)
    xo = jnp.einsum("bhqk,bhkd->bhqd", att, V).transpose(0, 2, 1, 3).reshape(n, d)
    attn = xo @ p["attn_fc_w"] + p["attn_fc_b"]
    xln = _layernorm_ref(attn + item_emb, p["n1_g"], p["n1_b"])
    ff = jnp.maximum(xln @ p["ff1_w"] + p["ff1_b"], 0.0) @ p["ff2_w"] + p["ff2_b"]
    item_out = _layernorm_ref(ff + xln, p["n2_g"], p["n2_b"])
    uo = jax.nn.sigmoid((user_emb @ p["um1_w"] + p["um1_b"]) @ p["um2_w"] + p["um2_b"])
    vec = jnp.concatenate([uo, item_out], axis=-1)
    vec = vec @ p["fc0_w"] + p["fc0_b"]
    vec = vec @ p["fc1_w"] + p["fc1_b"]
    return jax.nn.sigmoid(vec @ p["aff_w"] + p["aff_b"])


# ------------------------- deterministic params -------------------------
def _linear(key, in_dim, out_dim, scale=0.05):
    kw, kb = jax.random.split(key)
    w = scale * jax.random.normal(kw, (in_dim, out_dim), jnp.float32)
    b = scale * jax.random.normal(kb, (1, out_dim), jnp.float32)
    return w, b


def init_params(key, num_items, latent_dim, embed_dim, layers):
    ks = jax.random.split(key, 16)
    p = {}
    p["emb_item"] = 0.1 * jax.random.normal(ks[0], (num_items, latent_dim), jnp.float32)
    p["eu_w"], p["eu_b"] = _linear(ks[1], embed_dim, latent_dim)
    # multi-head attention (wq/wk only used by the reference; they cancel out)
    p["wq_w"], p["wq_b"] = _linear(ks[2], latent_dim, latent_dim)
    p["wk_w"], p["wk_b"] = _linear(ks[3], latent_dim, latent_dim)
    p["wv_w"], p["wv_b"] = _linear(ks[4], latent_dim, latent_dim)
    p["attn_fc_w"], p["attn_fc_b"] = _linear(ks[5], latent_dim, latent_dim)
    p["n1_g"] = jnp.ones((1, latent_dim), jnp.float32)
    p["n1_b"] = jnp.zeros((1, latent_dim), jnp.float32)
    p["n2_g"] = jnp.ones((1, latent_dim), jnp.float32)
    p["n2_b"] = jnp.zeros((1, latent_dim), jnp.float32)
    p["ff1_w"], p["ff1_b"] = _linear(ks[6], latent_dim, 2 * latent_dim)
    p["ff2_w"], p["ff2_b"] = _linear(ks[7], 2 * latent_dim, latent_dim)
    p["um1_w"], p["um1_b"] = _linear(ks[8], latent_dim, 2 * latent_dim)
    p["um2_w"], p["um2_b"] = _linear(ks[9], 2 * latent_dim, latent_dim)
    assert layers[0] == 2 * latent_dim
    p["fc0_w"], p["fc0_b"] = _linear(ks[10], layers[0], layers[1])
    p["fc1_w"], p["fc1_b"] = _linear(ks[11], layers[1], layers[2])
    p["aff_w"], p["aff_b"] = _linear(ks[12], layers[2], 1)
    return p


if __name__ == "__main__":
    NUM_ITEMS, LATENT_DIM, EMBED_DIM, N_ITEMS = 64, 32, 16, 8
    LAYERS = [2 * LATENT_DIM, 32, 16]

    root = jax.random.PRNGKey(0)
    k_params, k_items, k_uef = jax.random.split(root, 3)
    params = init_params(k_params, NUM_ITEMS, LATENT_DIM, EMBED_DIM, LAYERS)

    x = jax.random.randint(k_items, (1, N_ITEMS), 0, NUM_ITEMS, dtype=jnp.int32)
    uef = jax.random.normal(k_uef, (1, EMBED_DIM), jnp.float32)

    out = ufgraphfr_forward(x, uef, params)
    out = jax.block_until_ready(out)

    ref = reference_forward(x, uef, params)
    assert out.shape == (N_ITEMS, 1)
    assert jnp.allclose(out, ref, atol=2e-5, rtol=1e-5)
    print("KERNEL_OK")
</pallas_src>

<mosaic_0001>
module attributes {stable_mosaic.version = 11 : i64} {
  func.func @_kernel(%arg0: i32, %arg1: memref<8x32xf32, #tpu.memory_space<vmem>>, %arg2: memref<32x32xf32, #tpu.memory_space<vmem>>, %arg3: memref<1x32xf32, #tpu.memory_space<vmem>>, %arg4: memref<1x32xf32, #tpu.memory_space<vmem>>, %arg5: memref<1x32xf32, #tpu.memory_space<vmem>>, %arg6: memref<32x64xf32, #tpu.memory_space<vmem>>, %arg7: memref<1x64xf32, #tpu.memory_space<vmem>>, %arg8: memref<64x32xf32, #tpu.memory_space<vmem>>, %arg9: memref<1x32xf32, #tpu.memory_space<vmem>>, %arg10: memref<32x1xf32, #tpu.memory_space<vmem>>, %arg11: memref<1x1xf32, #tpu.memory_space<vmem>>, %arg12: memref<1x8xf32, #tpu.memory_space<vmem>>) attributes {dimension_semantics = [#tpu.dimension_semantics<parallel>], iteration_bounds = array<i64: 1>, scalar_prefetch = 0 : i64, scratch_operands = 0 : i64, tpu.core_type = #tpu.core_type<tc>, window_params = [{transform_indices = @transform_0, window_bounds = array<i64: 8, 32>}, {pipeline_mode = #tpu.pipeline_mode<synchronous>, transform_indices = @transform_1, window_bounds = array<i64: 32, 32>}, {pipeline_mode = #tpu.pipeline_mode<synchronous>, transform_indices = @transform_2, window_bounds = array<i64: 1, 32>}, {pipeline_mode = #tpu.pipeline_mode<synchronous>, transform_indices = @transform_3, window_bounds = array<i64: 1, 32>}, {pipeline_mode = #tpu.pipeline_mode<synchronous>, transform_indices = @transform_4, window_bounds = array<i64: 1, 32>}, {pipeline_mode = #tpu.pipeline_mode<synchronous>, transform_indices = @transform_5, window_bounds = array<i64: 32, 64>}, {pipeline_mode = #tpu.pipeline_mode<synchronous>, transform_indices = @transform_6, window_bounds = array<i64: 1, 64>}, {pipeline_mode = #tpu.pipeline_mode<synchronous>, transform_indices = @transform_7, window_bounds = array<i64: 64, 32>}, {pipeline_mode = #tpu.pipeline_mode<synchronous>, transform_indices = @transform_8, window_bounds = array<i64: 1, 32>}, {pipeline_mode = #tpu.pipeline_mode<synchronous>, transform_indices = @transform_9, window_bounds = array<i64: 32, 1>}, {pipeline_mode = #tpu.pipeline_mode<synchronous>, transform_indices = @transform_10, window_bounds = array<i64: 1, 1>}, {transform_indices = @transform_11, window_bounds = array<i64: 1, 8>}]} {
    %c0 = arith.constant 0 : index
    %c0_0 = arith.constant 0 : index
    %0 = vector.load %arg1[%c0, %c0_0] : memref<8x32xf32, #tpu.memory_space<vmem>>, vector<8x32xf32>
    %c0_1 = arith.constant 0 : index
    %c0_2 = arith.constant 0 : index
    %1 = vector.load %arg2[%c0_1, %c0_2] : memref<32x32xf32, #tpu.memory_space<vmem>>, vector<32x32xf32>
    %cst = arith.constant dense<0.000000e+00> : vector<8x32xf32>
    %2 = tpu.matmul %0, %1, %cst {dimension_numbers = #tpu.dot_dimension_numbers<[1], [0], [0], [1], [0, 0, 1, 1], [], []>} : vector<8x32xf32>, vector<32x32xf32>, vector<8x32xf32> -> vector<8x32xf32>
    %c0_3 = arith.constant 0 : index
    %c0_4 = arith.constant 0 : index
    %3 = vector.load %arg3[%c0_3, %c0_4] : memref<1x32xf32, #tpu.memory_space<vmem>>, vector<1x32xf32>
    %4 = vector.broadcast %3 : vector<1x32xf32> to vector<8x32xf32>
    %5 = arith.addf %2, %4 : vector<8x32xf32>
    %c0_5 = arith.constant 0 : index
    %c0_6 = arith.constant 0 : index
    %6 = vector.load %arg4[%c0_5, %c0_6] : memref<1x32xf32, #tpu.memory_space<vmem>>, vector<1x32xf32>
    %c0_7 = arith.constant 0 : index
    %c0_8 = arith.constant 0 : index
    %7 = vector.load %arg5[%c0_7, %c0_8] : memref<1x32xf32, #tpu.memory_space<vmem>>, vector<1x32xf32>
    %cst_9 = arith.constant dense<0.000000e+00> : vector<8xf32>
    %8 = vector.multi_reduction <add>, %5, %cst_9 [1] : vector<8x32xf32> to vector<8xf32>
    %9 = vector.shape_cast %8 : vector<8xf32> to vector<8x1xf32>
    %cst_10 = arith.constant 3.200000e+01 : f32
    %10 = vector.broadcast %cst_10 : f32 to vector<8x1xf32>
    %11 = arith.divf %9, %10 : vector<8x1xf32>
    %12 = vector.broadcast %11 : vector<8x1xf32> to vector<8x32xf32>
    %13 = arith.subf %5, %12 : vector<8x32xf32>
    %14 = arith.mulf %13, %13 : vector<8x32xf32>
    %cst_11 = arith.constant dense<0.000000e+00> : vector<8xf32>
    %15 = vector.multi_reduction <add>, %14, %cst_11 [1] : vector<8x32xf32> to vector<8xf32>
    %16 = vector.shape_cast %15 : vector<8xf32> to vector<8x1xf32>
    %cst_12 = arith.constant 3.200000e+01 : f32
    %17 = vector.broadcast %cst_12 : f32 to vector<8x1xf32>
    %18 = arith.divf %16, %17 : vector<8x1xf32>
    %cst_13 = arith.constant 9.99999974E-6 : f32
    %19 = vector.broadcast %cst_13 : f32 to vector<8x1xf32>
    %20 = arith.addf %18, %19 : vector<8x1xf32>
    %21 = math.rsqrt %20 : vector<8x1xf32>
    %22 = vector.broadcast %21 : vector<8x1xf32> to vector<8x32xf32>
    %23 = arith.mulf %13, %22 : vector<8x32xf32>
    %24 = vector.broadcast %6 : vector<1x32xf32> to vector<8x32xf32>
    %25 = arith.mulf %23, %24 : vector<8x32xf32>
    %26 = vector.broadcast %7 : vector<1x32xf32> to vector<8x32xf32>
    %27 = arith.addf %25, %26 : vector<8x32xf32>
    %c0_14 = arith.constant 0 : index
    %c0_15 = arith.constant 0 : index
    %28 = vector.load %arg6[%c0_14, %c0_15] : memref<32x64xf32, #tpu.memory_space<vmem>>, vector<32x64xf32>
    %cst_16 = arith.constant dense<0.000000e+00> : vector<8x64xf32>
    %29 = tpu.matmul %27, %28, %cst_16 {dimension_numbers = #tpu.dot_dimension_numbers<[1], [0], [0], [1], [0, 0, 1, 1], [], []>} : vector<8x32xf32>, vector<32x64xf32>, vector<8x64xf32> -> vector<8x64xf32>
    %c0_17 = arith.constant 0 : index
    %c0_18 = arith.constant 0 : index
    %30 = vector.load %arg7[%c0_17, %c0_18] : memref<1x64xf32, #tpu.memory_space<vmem>>, vector<1x64xf32>
    %31 = vector.broadcast %30 : vector<1x64xf32> to vector<8x64xf32>
    %32 = arith.addf %29, %31 : vector<8x64xf32>
    %cst_19 = arith.constant 0.000000e+00 : f32
    %33 = vector.broadcast %cst_19 : f32 to vector<8x64xf32>
    %34 = arith.maximumf %32, %33 : vector<8x64xf32>
    %c0_20 = arith.constant 0 : index
    %c0_21 = arith.constant 0 : index
    %35 = vector.load %arg8[%c0_20, %c0_21] : memref<64x32xf32, #tpu.memory_space<vmem>>, vector<64x32xf32>
    %cst_22 = arith.constant dense<0.000000e+00> : vector<8x32xf32>
    %36 = tpu.matmul %34, %35, %cst_22 {dimension_numbers = #tpu.dot_dimension_numbers<[1], [0], [0], [1], [0, 0, 1, 1], [], []>} : vector<8x64xf32>, vector<64x32xf32>, vector<8x32xf32> -> vector<8x32xf32>
    %c0_23 = arith.constant 0 : index
    %c0_24 = arith.constant 0 : index
    %37 = vector.load %arg9[%c0_23, %c0_24] : memref<1x32xf32, #tpu.memory_space<vmem>>, vector<1x32xf32>
    %38 = vector.broadcast %37 : vector<1x32xf32> to vector<8x32xf32>
    %39 = arith.addf %36, %38 : vector<8x32xf32>
    %40 = arith.addf %39, %27 : vector<8x32xf32>
    %cst_25 = arith.constant dense<0.000000e+00> : vector<8xf32>
    %41 = vector.multi_reduction <add>, %40, %cst_25 [1] : vector<8x32xf32> to vector<8xf32>
    %42 = vector.shape_cast %41 : vector<8xf32> to vector<8x1xf32>
    %cst_26 = arith.constant 3.200000e+01 : f32
    %43 = vector.broadcast %cst_26 : f32 to vector<8x1xf32>
    %44 = arith.divf %42, %43 : vector<8x1xf32>
    %45 = vector.broadcast %44 : vector<8x1xf32> to vector<8x32xf32>
    %46 = arith.subf %40, %45 : vector<8x32xf32>
    %47 = arith.mulf %46, %46 : vector<8x32xf32>
    %cst_27 = arith.constant dense<0.000000e+00> : vector<8xf32>
    %48 = vector.multi_reduction <add>, %47, %cst_27 [1] : vector<8x32xf32> to vector<8xf32>
    %49 = vector.shape_cast %48 : vector<8xf32> to vector<8x1xf32>
    %cst_28 = arith.constant 3.200000e+01 : f32
    %50 = vector.broadcast %cst_28 : f32 to vector<8x1xf32>
    %51 = arith.divf %49, %50 : vector<8x1xf32>
    %cst_29 = arith.constant 9.99999974E-6 : f32
    %52 = vector.broadcast %cst_29 : f32 to vector<8x1xf32>
    %53 = arith.addf %51, %52 : vector<8x1xf32>
    %54 = math.rsqrt %53 : vector<8x1xf32>
    %55 = vector.broadcast %54 : vector<8x1xf32> to vector<8x32xf32>
    %56 = arith.mulf %46, %55 : vector<8x32xf32>
    %c0_30 = arith.constant 0 : index
    %c0_31 = arith.constant 0 : index
    %57 = vector.load %arg10[%c0_30, %c0_31] : memref<32x1xf32, #tpu.memory_space<vmem>>, vector<32x1xf32>
    %cst_32 = arith.constant dense<0.000000e+00> : vector<8x1xf32>
    %58 = tpu.matmul %56, %57, %cst_32 {dimension_numbers = #tpu.dot_dimension_numbers<[1], [0], [0], [1], [0, 0, 1, 1], [], []>} : vector<8x32xf32>, vector<32x1xf32>, vector<8x1xf32> -> vector<8x1xf32>
    %c0_33 = arith.constant 0 : index
    %c0_34 = arith.constant 0 : index
    %59 = vector.load %arg11[%c0_33, %c0_34] : memref<1x1xf32, #tpu.memory_space<vmem>>, vector<1x1xf32>
    %60 = vector.broadcast %59 : vector<1x1xf32> to vector<8x1xf32>
    %61 = arith.addf %58, %60 : vector<8x1xf32>
    %62 = arith.negf %61 : vector<8x1xf32>
    %63 = math.exp %62 : vector<8x1xf32>
    %cst_35 = arith.constant 1.000000e+00 : f32
    %64 = vector.broadcast %cst_35 : f32 to vector<8x1xf32>
    %65 = arith.addf %64, %63 : vector<8x1xf32>
    %66 = arith.divf %64, %65 : vector<8x1xf32>
    %67 = tpu.transpose %66, [1, 0] : vector<8x1xf32> -> vector<1x8xf32>
    %c0_36 = arith.constant 0 : index
    %c0_37 = arith.constant 0 : index
    %68 = vector.load %arg12[%c0_36, %c0_37] : memref<1x8xf32, #tpu.memory_space<vmem>>, vector<1x8xf32>
    tpu.vector_store %arg12[%c0_36, %c0_37], %67 {strides = array<i32>} : memref<1x8xf32, #tpu.memory_space<vmem>>, vector<1x8xf32>,
    return
  }
  func.func @transform_0(%arg0: i32) -> (i32, i32) {
    %c0_i32 = arith.constant 0 : i32
    %c0_i32_0 = arith.constant 0 : i32
    return %arg0, %c0_i32 : i32, i32
  }
  func.func @transform_1(%arg0: i32) -> (i32, i32) {
    %c0_i32 = arith.constant 0 : i32
    %c0_i32_0 = arith.constant 0 : i32
    %c0_i32_1 = arith.constant 0 : i32
    return %c0_i32, %c0_i32_0 : i32, i32
  }
  func.func @transform_2(%arg0: i32) -> (i32, i32) {
    %c0_i32 = arith.constant 0 : i32
    %c0_i32_0 = arith.constant 0 : i32
    %c0_i32_1 = arith.constant 0 : i32
    return %c0_i32, %c0_i32_0 : i32, i32
  }
  func.func @transform_3(%arg0: i32) -> (i32, i32) {
    %c0_i32 = arith.constant 0 : i32
    %c0_i32_0 = arith.constant 0 : i32
    %c0_i32_1 = arith.constant 0 : i32
    return %c0_i32, %c0_i32_0 : i32, i32
  }
  func.func @transform_4(%arg0: i32) -> (i32, i32) {
    %c0_i32 = arith.constant 0 : i32
    %c0_i32_0 = arith.constant 0 : i32
    %c0_i32_1 = arith.constant 0 : i32
    return %c0_i32, %c0_i32_0 : i32, i32
  }
  func.func @transform_5(%arg0: i32) -> (i32, i32) {
    %c0_i32 = arith.constant 0 : i32
    %c0_i32_0 = arith.constant 0 : i32
    %c0_i32_1 = arith.constant 0 : i32
    return %c0_i32, %c0_i32_0 : i32, i32
  }
  func.func @transform_6(%arg0: i32) -> (i32, i32) {
    %c0_i32 = arith.constant 0 : i32
    %c0_i32_0 = arith.constant 0 : i32
    %c0_i32_1 = arith.constant 0 : i32
    return %c0_i32, %c0_i32_0 : i32, i32
  }
  func.func @transform_7(%arg0: i32) -> (i32, i32) {
    %c0_i32 = arith.constant 0 : i32
    %c0_i32_0 = arith.constant 0 : i32
    %c0_i32_1 = arith.constant 0 : i32
    return %c0_i32, %c0_i32_0 : i32, i32
  }
  func.func @transform_8(%arg0: i32) -> (i32, i32) {
    %c0_i32 = arith.constant 0 : i32
    %c0_i32_0 = arith.constant 0 : i32
    %c0_i32_1 = arith.constant 0 : i32
    return %c0_i32, %c0_i32_0 : i32, i32
  }
  func.func @transform_9(%arg0: i32) -> (i32, i32) {
    %c0_i32 = arith.constant 0 : i32
    %c0_i32_0 = arith.constant 0 : i32
    %c0_i32_1 = arith.constant 0 : i32
    return %c0_i32, %c0_i32_0 : i32, i32
  }
  func.func @transform_10(%arg0: i32) -> (i32, i32) {
    %c0_i32 = arith.constant 0 : i32
    %c0_i32_0 = arith.constant 0 : i32
    %c0_i32_1 = arith.constant 0 : i32
    return %c0_i32, %c0_i32_0 : i32, i32
  }
  func.func @transform_11(%arg0: i32) -> (i32, i32) {
    %c0_i32 = arith.constant 0 : i32
    %c0_i32_0 = arith.constant 0 : i32
    return %c0_i32, %arg0 : i32, i32
  }
}

</mosaic_0001>

<bundles_post_ra>
// kernel: tpu_custom_call.1
= control target key start
LH: loop header
LB: loop body
LE: loop exit
PB: predicated region body
PF: predicated region fallthrough
CT: control target
= control target key end

     0   :  { %s785_s0 = inlined_call_operand.vmem [shape: f32[8,32], index: 0, kind: input, shape index: {}]   ;;  %s786_s1 = inlined_call_operand.vmem [shape: f32[32,32], index: 1, kind: input, shape index: {}]   ;;  %s787_s2 = inlined_call_operand.vmem [shape: f32[1,32], index: 2, kind: input, shape index: {}]   ;;  %s788_s3 = inlined_call_operand.vmem [shape: f32[1,32], index: 3, kind: input, shape index: {}]   ;;  %s789_s4 = inlined_call_operand.vmem [shape: f32[1,32], index: 4, kind: input, shape index: {}]   ;;  %s790_s5 = inlined_call_operand.vmem [shape: f32[32,64], index: 5, kind: input, shape index: {}]   ;;  %s791_s6 = inlined_call_operand.vmem [shape: f32[1,64], index: 6, kind: input, shape index: {}]   ;;  %s792_s7 = inlined_call_operand.vmem [shape: f32[64,32], index: 7, kind: input, shape index: {}]   ;;  %s793_s8 = inlined_call_operand.vmem [shape: f32[1,32], index: 8, kind: input, shape index: {}]   ;;  %s794_s9 = inlined_call_operand.vmem [shape: f32[32,1], index: 9, kind: input, shape index: {}]   ;;  %s795_s10 = inlined_call_operand.<no memory space> [shape: f32[1,1], index: 10, kind: input, shape index: {}]   ;;  %s796_s11 = inlined_call_operand.hbm [shape: f32[1,8], index: 11, kind: output, shape index: {}]  }
   0x1   :  { %v16_v0 = vstv %s795_s10 }
   0x2   :  { %17 = vst [vmem:[#allocation2] sm:$0x1] %v16_v0 }
   0x3   :  { %v45_v1 = vld [vmem:[%s786_s1 + $0x18] sm:$0xff]  ;;  %v603_v2 = vmov 0.0   ;;  %v44_v3 = vld [vmem:[%s786_s1 + $0x10] sm:$0xff]  ;;  %vm604_vm0 = vmmov 0  }
   0x4   :  { %518 = vmatprep.subr.mxu0 %v603_v2  ;;  %526 = vmatprep.mubr.msk.f32.mxu0 %vm604_vm0, %v603_v2 }
   0x5   :  { %519 = vmatpush3.msra.mxu0 %v45_v1  ;;  %529 = vmatprep.subr.mxu1 %v603_v2 }
   0x6   :  { %18 = vsyncpa [#allocation4], 0  ;;  %520 = vmatprep.subr.mxu0 %v603_v2  ;;  %v43_v4 = vld [vmem:[%s786_s1 + $0x8] sm:$0xff]  ;;  %537 = vmatprep.mubr.msk.f32.mxu1 %vm604_vm0, %v603_v2  ;;  %v42_v5 = vld [vmem:[%s786_s1] sm:$0xff]  ;;  %vm53_vm1 = vcmask 261120   ;;  %vm257_vm2 = vcmask 523264  }
   0x7   :  { %521 = vmatpush3.msra.mxu0 %v44_v3  ;;  %v41_v6 = vld [vmem:[%s785_s0] sm:$0xff]  ;;  %v160_v17 = vld [vmem:[%s790_s5 + $0x18] sm:$0xff]  ;;  %v159_v18 = vld [vmem:[%s790_s5 + $0x10] sm:$0xff]  ;;  %vm467_vm3 = vcmask 57344  }
   0x8   :  { %522 = vmatprep.subr.mxu0 %v603_v2  ;;  %v483_v7 = vld [vmem:[%s787_s2] ss:$0 sm:$0xff]  ;;  %530 = vmatpush3.msra.mxu1 %v160_v17  ;;  %v158_v19 = vld [vmem:[%s790_s5 + $0x8] sm:$0xff]  ;;  %v249_v21 = vld [vmem:[%s792_s7 + $0x38] sm:$0xff] }
   0x9   :  { %523 = vmatpush3.msra.mxu0 %v43_v4  ;;  %531 = vmatprep.subr.mxu1 %v603_v2  ;;  %v157_v20 = vld [vmem:[%s790_s5] sm:$0xff]  ;;  %v248_v22 = vld [vmem:[%s792_s7 + $0x30] sm:$0xff]  ;;  %v247_v23 = vld [vmem:[%s792_s7 + $0x28] sm:$0xff] }
   0xa   :  { %524 = vmatprep.subr.mxu0 %v603_v2  ;;  %532 = vmatpush3.msra.mxu1 %v159_v18  ;;  %v246_v24 = vld [vmem:[%s792_s7 + $0x20] sm:$0xff]  ;;  %v245_v25 = vld [vmem:[%s792_s7 + $0x18] sm:$0xff]  ;;  %v244_v35 = vld [vmem:[%s792_s7 + $0x10] sm:$0xff] }
   0xb   :  { %525 = vmatpush3.msra.mxu0 %v42_v5  ;;  %533 = vmatprep.subr.mxu1 %v603_v2  ;;  %v485_v30 = vld [vmem:[%s788_s3] ss:$0 sm:$0xff]  ;;  %v243_v36 = vld [vmem:[%s792_s7 + $0x8] sm:$0xff]  ;;  %v348_v54 = vld [vmem:[%s794_s9 + $0x18] sm:$0xff] }
   0xc   :  { %527 = vmatmul.mubr.msk.f32.vlgmr.msra.gmra.mxu0 %vm53_vm1, %v41_v6  ;;  %540 = vmatprep.subr.mxu0 %v603_v2  ;;  %v486_v32 = vld [vmem:[%s789_s4] ss:$0 sm:$0xff]  ;;  %v347_v55 = vld [vmem:[%s794_s9 + $0x10] sm:$0xff]  ;;  %v346_v56 = vld [vmem:[%s794_s9 + $0x8] sm:$0xff] }
   0xd   :  { %556 = vmatprep.mubr.msk.f32.mxu0 %vm604_vm0, %v603_v2  ;;  %534 = vmatpush3.msra.mxu1 %v158_v19  ;;  %v242_v37 = vld [vmem:[%s792_s7] sm:$0xff] }
   0xe   :  { %535 = vmatprep.subr.mxu1 %v603_v2  ;;  %541 = vmatpush3.msra.mxu0 %v249_v21  ;;  %v487_v38 = vld [vmem:[%s791_s6] ss:$0 sm:$0xff] }
   0xf   :  { %536 = vmatpush3.msra.mxu1 %v157_v20  ;;  %542 = vmatprep.subr.mxu0 %v603_v2  ;;  %v489_v43 = vld [vmem:[%s793_s8] ss:$0 sm:$0xff] }
  0x10   :  { %559 = vmatprep.subr.mxu1 %v603_v2  ;;  %543 = vmatpush3.msra.mxu0 %v248_v22  ;;  %v345_v57 = vld [vmem:[%s794_s9] sm:$0xff]  ;;  %s605_s9 = smov [#allocation3]  }
  0x11   :  { %544 = vmatprep.subr.mxu0 %v603_v2  ;;  %v491_v63 = vld [vmem:[#allocation2] ss:$0 sm:$0xff]  ;;  %s475_s19 = sshll.u32 %s605_s9, 4  ;;  %s476_s19 = int_to_ptr.vmem [resolvable:$true] %s475_s19 }
  0x12   :  { %545 = vmatpush3.msra.mxu0 %v247_v23  ;;  %s581_s20 = scalar_lea.vmem %s476_s19, 16  ;;  %s585_s21 = scalar_lea.vmem %s476_s19, 32 }
  0x13   :  { %546 = vmatprep.subr.mxu0 %v603_v2  ;;  %p582_p0 = scmp.ne.s32.totalorder %s476_s19, %s581_s20  ;;  %p586_p1 = scmp.lt.s32.totalorder %s476_s19, %s476_s19 }
  0x14   :  { %547 = vmatpush3.msra.mxu0 %v246_v24  ;;  %p587_p2 = scmp.lt.s32.totalorder %s585_s21, %s581_s20 }
  0x15   :  { %548 = vmatprep.subr.mxu0 %v603_v2 }
  0x16   :  { %549 = vmatpush3.msra.mxu0 %v245_v25  ;;  %p588_p3 = por %p587_p2, %p586_p1 }
  0x17   :  { %550 = vmatprep.subr.mxu0 %v603_v2 }
  0x18   :  { %551 = vmatpush3.msra.mxu0 %v244_v35  ;;  %p589_p4 = pnand %p588_p3, %p582_p0 }
  0x19   :  { %552 = vmatprep.subr.mxu0 %v603_v2 }
  0x1a   :  { %553 = vmatpush3.msra.mxu0 %v243_v36 }
  0x1b   :  { %554 = vmatprep.subr.mxu0 %v603_v2 }
  0x1c   :  { %555 = vmatpush3.msra.mxu0 %v242_v37 }
  0xcc   :  { %v123_v8 = vpop.f32.mrf.mxu0 }
  0xcd   :  { %v124_v9 = vadd.f32 %v483_v7, %v123_v8 }
  0xce   :  { %v528_v10 = vpop.f32.mrf.mxu0 }
  0xcf   :  { %v129_v11 = vsel %vm53_vm1, %v124_v9, 0.0 }
  0xd0   :  { %130 = vadd.xlane.f32.xlu0 %v129_v11 }
 0x159   :  { %v131_v12 = vpop.xlane.xlu0 %130 }
 0x15a   :  { %v133_v13 = vmul.f32 0.03125, %v131_v12 }
 0x15c   :  { %v134_v14 = vsub.f32 %v124_v9, %v133_v13 }
 0x15e   :  { %v135_v15 = vmul.f32 %v134_v14, %v134_v14 }
 0x160   :  { %v136_v16 = vsel %vm53_vm1, %v135_v15, 0.0 }
 0x161   :  { %137 = vadd.xlane.f32.xlu0 %v136_v16 }
 0x1ea   :  { %v138_v26 = vpop.xlane.xlu0 %137 }
 0x1eb   :  { %v139_v27 = vmul.f32 0.03125, %v138_v26 }
 0x1ed   :  { %v140_v28 = vadd.f32 1e-05, %v139_v27 }
 0x1ef   :  { %573 = vrsqrt.f32 %v140_v28 }
 0x1fc   :  { %v574_v29 = vpop.eup %573 }
 0x1fd   :  { %v142_v31 = vmul.f32 %v574_v29, %v134_v14 }
 0x1ff   :  { %v149_v33 = vmul.f32 %v485_v30, %v142_v31 }
 0x201   :  { %v156_v34 = vadd.f32 %v486_v32, %v149_v33 }
 0x203   :  { %538 = vmatmul.mubr.msk.f32.vlgmr.msra.gmra.mxu1 %vm53_vm1, %v156_v34 }
 0x204   :  { %567 = vmatprep.mubr.msk.f32.mxu1 %vm604_vm0, %v603_v2  ;;  %560 = vmatpush3.msra.mxu1 %v348_v54 }
 0x205   :  { %561 = vmatprep.subr.mxu1 %v603_v2 }
 0x206   :  { %562 = vmatpush3.msra.mxu1 %v347_v55 }
 0x207   :  { %563 = vmatprep.subr.mxu1 %v603_v2 }
 0x208   :  { %564 = vmatpush3.msra.mxu1 %v346_v56 }
 0x209   :  { %565 = vmatprep.subr.mxu1 %v603_v2 }
 0x20a   :  { %566 = vmatpush3.msra.mxu1 %v345_v57 }
 0x2c3   :  { %v237_v39 = vpop.f32.mrf.mxu1 }
 0x2c4   :  { %v238_v40 = vadd.f32 %v487_v38, %v237_v39 }
 0x2c5   :  { %v539_v41 = vpop.f32.mrf.mxu1 }
 0x2c6   :  { %v241_v42 = vmax.f32 %v238_v40, 0.0 }
 0x2c8   :  { %557 = vmatmul.mubr.msk.f32.vlgmr.msra.gmra.mxu0 %vm257_vm2, %v241_v42 }
 0x388   :  { %v327_v44 = vpop.f32.mrf.mxu0 }
 0x389   :  { %v328_v45 = vadd.f32 %v489_v43, %v327_v44 }
 0x38a   :  { %v558_v46 = vpop.f32.mrf.mxu0 }
 0x38b   :  { %v331_v47 = vadd.f32 %v328_v45, %v156_v34 }
 0x38d   :  { %v332_v48 = vsel %vm53_vm1, %v331_v47, 0.0 }
 0x38e   :  { %333 = vadd.xlane.f32.xlu1 %v332_v48 }
 0x417   :  { %v334_v49 = vpop.xlane.xlu1 %333 }
 0x418   :  { %v335_v50 = vmul.f32 0.03125, %v334_v49 }
 0x41a   :  { %v336_v51 = vsub.f32 %v331_v47, %v335_v50 }
 0x41c   :  { %v337_v52 = vmul.f32 %v336_v51, %v336_v51 }
 0x41e   :  { %v338_v53 = vsel %vm53_vm1, %v337_v52, 0.0 }
 0x41f   :  { %339 = vadd.xlane.f32.xlu1 %v338_v53 }
 0x4a8   :  { %v340_v58 = vpop.xlane.xlu1 %339 }
 0x4a9   :  { %v341_v59 = vmul.f32 0.03125, %v340_v58 }
 0x4ab   :  { %v342_v60 = vadd.f32 1e-05, %v341_v59 }
 0x4ad   :  { %575 = vrsqrt.f32 %v342_v60 }
 0x4ba   :  { %v576_v61 = vpop.eup %575 }
 0x4bb   :  { %v344_v62 = vmul.f32 %v576_v61, %v336_v51 }
 0x4bd   :  { %568 = vmatmul.mubr.msk.f32.vlgmr.msra.gmra.mxu1 %vm53_vm1, %v344_v62 }
 0x57d   :  { %v425_v0 = vpop.f32.mrf.mxu1 }
 0x57e   :  { %v426_v1 = vadd.f32 %v491_v63, %v425_v0 }
 0x57f   :  { %v569_v3 = vpop.f32.mrf.mxu1 }
 0x580   :  { %v493_v4 = vmul.f32 -1.442695, %v426_v1 }
 0x582   :  { %577 = vpow2.f32 %v493_v4 }
 0x58f   :  { %v578_v5 = vpop.eup %577 }
 0x590   :  { %v432_v6 = vadd.f32 1.0, %v578_v5 }
 0x592   :  { %579 = vrcp.f32 %v432_v6 }
 0x59f   :  { %v580_v7 = vpop.eup %579 }
 0x5a0   :  { %435 = vxpose.xlu0.b32.start.end [1/1] (short) (narrow) %v580_v7, 8 }
 0x61c   :  { %v451_v2 = vpop.trf.xlu0 }
 0x61d   :  { %468 = vst.msk [vmem:[#allocation3] sm:$0x1] %vm467_vm3, %v451_v2 }
 0x61e   :  { %592 = shalt.err (!%p589_p4)
}
 0x61f   :  { %478 = dma.vmem_to_hbm [thread:$0]  %s476_s19, 16, %s796_s11, [#allocation4]  }
 0x620   :  { %601 = dma.done.wait [#allocation4], 16  }
 0x621   :  { %602 = vsyncadd [#allocation4], 4294967280 }
 0x622   :  { %482 = vsyncpa [#allocation4], 1 }

</bundles_post_ra>
